<compile_context>
chip_gen: v7x
topology: tpu7x:2x2x1
jax: 0.10.0
libtpu: 0.0.40
codegen_flags: <defaults>
</compile_context>

<pallas_src>
import functools

import jax
import jax.numpy as jnp
import numpy as np
from jax import lax
from jax.experimental import pallas as pl
from jax.experimental.pallas import tpu as pltpu


# ----------------------------- Pallas kernels -----------------------------

def _fused_conv_bn_relu_kernel(x_ref, w_ref, mask_ref, gb_ref, o_ref, col_ref,
                               *, N, Cin, HW, offsets, eps):
    """Dilated Conv2d + BatchNorm2d (train-mode batch stats) + ReLU, 1 grid step.

    x_ref    : (N*Cin, H*W)        flattened lane-dense input (one row per (n, cin))
    w_ref    : (Cout, K*K*Cin)     conv weight, im2col layout (kh, kw, cin)
    mask_ref : (K*K, H*W)          1.0 where the tap is in-bounds, else 0.0
    gb_ref   : (Cout, 2)           [:, 0] = BN gamma, [:, 1] = BN beta
    o_ref    : (N, Cout, H*W)      output (NCHW-flat)
    col_ref  : (N, K*K*Cin, H*W)   VMEM scratch: im2col matrix per batch element
    """
    x = x_ref[...]                                    # (N*Cin, HW), lane-dense

    # Build the im2col matrix lane-dense: each tap is a full-width lane roll of
    # the flattened input times a precomputed boundary mask.  Roll wrap-around
    # lands only on out-of-bounds positions, which the mask zeroes.
    for t, off in enumerate(offsets):                 # K*K static taps, unrolled
        shift = (-off) % HW
        tap = x if shift == 0 else pltpu.roll(x, shift, axis=1)
        tap = tap * mask_ref[t:t + 1, :]              # (N*Cin, HW) * (1, HW)
        for n in range(N):
            col_ref[n, t * Cin:(t + 1) * Cin, :] = tap[n * Cin:(n + 1) * Cin, :]

    # One MXU matmul per batch element: (Cout, K*K*Cin) x (K*K*Cin, HW).
    # Conv bias is omitted: with train-mode BatchNorm (batch statistics) a
    # per-channel bias cancels exactly in (y - mean).
    w = w_ref[...]
    for n in range(N):
        o_ref[n] = jnp.dot(w, col_ref[n], preferred_element_type=jnp.float32)

    # BatchNorm2d (biased batch variance) + ReLU over the whole VMEM-resident
    # output.  The reduction axis (H*W) sits on lanes; axis 0 is tiny.
    y = o_ref[...]                                    # (N, Cout, HW)
    mean = jnp.mean(y, axis=(0, 2), keepdims=True)    # (1, Cout, 1)
    var = jnp.mean((y - mean) ** 2, axis=(0, 2), keepdims=True)
    gamma = gb_ref[:, 0:1]                            # (Cout, 1)
    beta = gb_ref[:, 1:2]                             # (Cout, 1)
    scale = gamma[None, :, :] * lax.rsqrt(var + eps)  # (1, Cout, 1)
    shift_ = beta[None, :, :] - mean * scale
    o_ref[...] = jnp.maximum(y * scale + shift_, 0.0)


def _global_aspp_kernel(x_ref, w_ref, b_ref, o_ref):
    """AdaptiveAvgPool2d((1,1)) -> 1x1 conv (matmul) -> ReLU.

    x_ref: (N, Cin, H*W);  w_ref: (Cin, Cout);  b_ref: (1, Cout);  o_ref: (N, Cout)
    """
    pooled = jnp.mean(x_ref[...], axis=2)             # (N, Cin), lane reduce
    out = jnp.dot(pooled, w_ref[...],
                  preferred_element_type=jnp.float32) + b_ref[...]
    o_ref[...] = jnp.maximum(out, 0.0)


# ------------------------------- wrappers ---------------------------------

def aspp_block(x_nchw, params, *, kernel_size, dilation, is_global):
    """Forward pass of ASPPblock. Input/output are NCHW (PyTorch convention)."""
    x = x_nchw.astype(jnp.float32)
    N, Cin, H, W = x.shape
    HW = H * W

    if is_global:
        w = params["w"]                               # (Cin, Cout) (1x1 conv weight)
        b = params["b"]                               # (Cout,)
        Cout = w.shape[1]
        out = pl.pallas_call(
            _global_aspp_kernel,
            out_shape=jax.ShapeDtypeStruct((N, Cout), jnp.float32),
        )(x.reshape(N, Cin, HW), w, b.reshape(1, Cout))
        return out.reshape(N, Cout, 1, 1)

    K = kernel_size
    dil = dilation
    pad = 0 if K == 1 else dil
    w = params["w"]                                   # (K, K, Cin, Cout) (HWIO)
    gamma = params["gamma"]                           # (Cout,)
    beta = params["beta"]                             # (Cout,)
    Cout = w.shape[-1]

    # Weight in im2col layout: rows = Cout, cols ordered (kh, kw, cin).
    w2d = jnp.transpose(w, (3, 0, 1, 2)).reshape(Cout, K * K * Cin)
    # gamma/beta packed into a single tiny operand (one DMA instead of two).
    gb = jnp.stack([gamma, beta], axis=1)             # (Cout, 2)

    # Static tap offsets (in flattened H*W index space) and validity masks.
    offsets = []
    mask_rows = []
    for kh in range(K):
        for kw in range(K):
            dh = kh * dil - pad
            dw = kw * dil - pad
            offsets.append(dh * W + dw)
            hh = np.arange(H)[:, None] + dh
            ww = np.arange(W)[None, :] + dw
            valid = (hh >= 0) & (hh < H) & (ww >= 0) & (ww < W)
            mask_rows.append(valid.reshape(-1))
    mask = jnp.asarray(np.stack(mask_rows, axis=0).astype(np.float32))  # (K*K, HW)

    kernel = functools.partial(
        _fused_conv_bn_relu_kernel,
        N=N, Cin=Cin, HW=HW, offsets=tuple(offsets), eps=1e-5)

    out = pl.pallas_call(
        kernel,
        out_shape=jax.ShapeDtypeStruct((N, Cout, HW), jnp.float32),
        scratch_shapes=[pltpu.VMEM((N, K * K * Cin, HW), jnp.float32)],
    )(x.reshape(N * Cin, HW), w2d, mask, gb)

    return out.reshape(N, Cout, H, W)                 # NCHW, no transpose needed


# ------------------------- pure-JAX reference ------------------------------

def aspp_reference(x_nchw, params, *, kernel_size, dilation, is_global):
    x = x_nchw.astype(jnp.float32)
    if is_global:
        pooled = jnp.mean(x, axis=(2, 3), keepdims=True)          # (N, Cin, 1, 1)
        out = jnp.einsum("ncij,cd->ndij", pooled, params["w"])
        out = out + params["b"][None, :, None, None]
        return jnp.maximum(out, 0.0)
    pad = 0 if kernel_size == 1 else dilation
    out = lax.conv_general_dilated(
        x, params["w"], window_strides=(1, 1),
        padding=[(pad, pad), (pad, pad)],
        rhs_dilation=(dilation, dilation),
        dimension_numbers=("NCHW", "HWIO", "NCHW"))
    out = out + params["b"][None, :, None, None]
    mean = jnp.mean(out, axis=(0, 2, 3), keepdims=True)
    var = jnp.mean((out - mean) ** 2, axis=(0, 2, 3), keepdims=True)
    out = (out - mean) / jnp.sqrt(var + 1e-5)
    out = out * params["gamma"][None, :, None, None] + params["beta"][None, :, None, None]
    return jnp.maximum(out, 0.0)


# --------------------------------- main ------------------------------------

if __name__ == "__main__":
    key = jax.random.PRNGKey(0)
    k_x, k_w1, k_b1, k_w2, k_b2 = jax.random.split(key, 5)

    N, Cin, Cout, H, W = 2, 4, 8, 16, 16
    kernel_size, dilation = 3, 2

    x = jax.random.normal(k_x, (N, Cin, H, W), dtype=jnp.float32)

    # Deterministic synthetic parameters (PyTorch defaults: gamma=1, beta=0).
    params_conv = {
        "w": 0.1 * jax.random.normal(k_w1, (kernel_size, kernel_size, Cin, Cout),
                                     dtype=jnp.float32),
        "b": 0.1 * jax.random.normal(k_b1, (Cout,), dtype=jnp.float32),
        "gamma": jnp.ones((Cout,), dtype=jnp.float32),
        "beta": jnp.zeros((Cout,), dtype=jnp.float32),
    }
    params_global = {
        "w": 0.1 * jax.random.normal(k_w2, (Cin, Cout), dtype=jnp.float32),
        "b": 0.1 * jax.random.normal(k_b2, (Cout,), dtype=jnp.float32),
    }

    # Non-global branch: fused dilated conv + BN + ReLU
    out_conv = aspp_block(x, params_conv, kernel_size=kernel_size,
                          dilation=dilation, is_global=False)
    out_conv = jax.block_until_ready(out_conv)
    ref_conv = aspp_reference(x, params_conv, kernel_size=kernel_size,
                              dilation=dilation, is_global=False)
    np.testing.assert_allclose(np.asarray(out_conv), np.asarray(ref_conv),
                               rtol=1e-4, atol=1e-4)

    # Global branch: adaptive avg-pool + 1x1 conv + ReLU
    out_glob = aspp_block(x, params_global, kernel_size=1,
                          dilation=1, is_global=True)
    out_glob = jax.block_until_ready(out_glob)
    ref_glob = aspp_reference(x, params_global, kernel_size=1,
                              dilation=1, is_global=True)
    np.testing.assert_allclose(np.asarray(out_glob), np.asarray(ref_glob),
                               rtol=1e-4, atol=1e-4)

    print("KERNEL_OK")
</pallas_src>

<mosaic_0001>
module attributes {stable_mosaic.version = 11 : i64} {
  func.func @_fused_conv_bn_relu_kernel(%arg0: memref<8x256xf32, #tpu.memory_space<vmem>>, %arg1: memref<8x36xf32, #tpu.memory_space<vmem>>, %arg2: memref<9x256xf32, #tpu.memory_space<vmem>>, %arg3: memref<8x2xf32, #tpu.memory_space<vmem>>, %arg4: memref<2x8x256xf32, #tpu.memory_space<vmem>>, %arg5: memref<2x36x256xf32, #tpu.memory_space<vmem>>) attributes {dimension_semantics = [], scalar_prefetch = 0 : i64, scratch_operands = 1 : i64, tpu.core_type = #tpu.core_type<tc>} {
    %c0 = arith.constant 0 : index
    %c0_0 = arith.constant 0 : index
    %0 = vector.load %arg0[%c0, %c0_0] : memref<8x256xf32, #tpu.memory_space<vmem>>, vector<8x256xf32>
    %c34_i32 = arith.constant 34 : i32
    %1 = tpu.dynamic_rotate %0 by %c34_i32 dim 1 : vector<8x256xf32>, i32 -> vector<8x256xf32>
    %c0_1 = arith.constant 0 : index
    %c0_2 = arith.constant 0 : index
    %2 = vector.load %arg2[%c0_1, %c0_2] : memref<9x256xf32, #tpu.memory_space<vmem>>, vector<1x256xf32>
    %3 = vector.broadcast %2 : vector<1x256xf32> to vector<8x256xf32>
    %4 = arith.mulf %1, %3 : vector<8x256xf32>
    %5 = vector.extract_strided_slice %4 {offsets = [0, 0], sizes = [4, 256], strides = [1, 1]} : vector<8x256xf32> to vector<4x256xf32>
    %c0_3 = arith.constant 0 : index
    %c0_4 = arith.constant 0 : index
    %c0_5 = arith.constant 0 : index
    %6 = vector.load %arg5[%c0_3, %c0_4, %c0_5] : memref<2x36x256xf32, #tpu.memory_space<vmem>>, vector<1x4x256xf32>
    %7 = vector.shape_cast %6 : vector<1x4x256xf32> to vector<4x256xf32>
    %8 = vector.shape_cast %5 : vector<4x256xf32> to vector<1x4x256xf32>
    tpu.vector_store %arg5[%c0_3, %c0_4, %c0_5], %8 {strides = array<i32>} : memref<2x36x256xf32, #tpu.memory_space<vmem>>, vector<1x4x256xf32>,
    %9 = vector.extract_strided_slice %4 {offsets = [4, 0], sizes = [4, 256], strides = [1, 1]} : vector<8x256xf32> to vector<4x256xf32>
    %c1 = arith.constant 1 : index
    %c0_6 = arith.constant 0 : index
    %c0_7 = arith.constant 0 : index
    %10 = vector.load %arg5[%c1, %c0_6, %c0_7] : memref<2x36x256xf32, #tpu.memory_space<vmem>>, vector<1x4x256xf32>
    %11 = vector.shape_cast %10 : vector<1x4x256xf32> to vector<4x256xf32>
    %12 = vector.shape_cast %9 : vector<4x256xf32> to vector<1x4x256xf32>
    tpu.vector_store %arg5[%c1, %c0_6, %c0_7], %12 {strides = array<i32>} : memref<2x36x256xf32, #tpu.memory_space<vmem>>, vector<1x4x256xf32>,
    %c32_i32 = arith.constant 32 : i32
    %13 = tpu.dynamic_rotate %0 by %c32_i32 dim 1 : vector<8x256xf32>, i32 -> vector<8x256xf32>
    %c1_8 = arith.constant 1 : index
    %c0_9 = arith.constant 0 : index
    %14 = vector.load %arg2[%c1_8, %c0_9] : memref<9x256xf32, #tpu.memory_space<vmem>>, vector<1x256xf32>
    %15 = vector.broadcast %14 : vector<1x256xf32> to vector<8x256xf32>
    %16 = arith.mulf %13, %15 : vector<8x256xf32>
    %17 = vector.extract_strided_slice %16 {offsets = [0, 0], sizes = [4, 256], strides = [1, 1]} : vector<8x256xf32> to vector<4x256xf32>
    %c0_10 = arith.constant 0 : index
    %c4 = arith.constant 4 : index
    %c0_11 = arith.constant 0 : index
    %18 = vector.load %arg5[%c0_10, %c4, %c0_11] : memref<2x36x256xf32, #tpu.memory_space<vmem>>, vector<1x4x256xf32>
    %19 = vector.shape_cast %18 : vector<1x4x256xf32> to vector<4x256xf32>
    %20 = vector.shape_cast %17 : vector<4x256xf32> to vector<1x4x256xf32>
    tpu.vector_store %arg5[%c0_10, %c4, %c0_11], %20 {strides = array<i32>} : memref<2x36x256xf32, #tpu.memory_space<vmem>>, vector<1x4x256xf32>,
    %21 = vector.extract_strided_slice %16 {offsets = [4, 0], sizes = [4, 256], strides = [1, 1]} : vector<8x256xf32> to vector<4x256xf32>
    %c1_12 = arith.constant 1 : index
    %c4_13 = arith.constant 4 : index
    %c0_14 = arith.constant 0 : index
    %22 = vector.load %arg5[%c1_12, %c4_13, %c0_14] : memref<2x36x256xf32, #tpu.memory_space<vmem>>, vector<1x4x256xf32>
    %23 = vector.shape_cast %22 : vector<1x4x256xf32> to vector<4x256xf32>
    %24 = vector.shape_cast %21 : vector<4x256xf32> to vector<1x4x256xf32>
    tpu.vector_store %arg5[%c1_12, %c4_13, %c0_14], %24 {strides = array<i32>} : memref<2x36x256xf32, #tpu.memory_space<vmem>>, vector<1x4x256xf32>,
    %c30_i32 = arith.constant 30 : i32
    %25 = tpu.dynamic_rotate %0 by %c30_i32 dim 1 : vector<8x256xf32>, i32 -> vector<8x256xf32>
    %c2 = arith.constant 2 : index
    %c0_15 = arith.constant 0 : index
    %26 = vector.load %arg2[%c2, %c0_15] : memref<9x256xf32, #tpu.memory_space<vmem>>, vector<1x256xf32>
    %27 = vector.broadcast %26 : vector<1x256xf32> to vector<8x256xf32>
    %28 = arith.mulf %25, %27 : vector<8x256xf32>
    %29 = vector.extract_strided_slice %28 {offsets = [0, 0], sizes = [4, 256], strides = [1, 1]} : vector<8x256xf32> to vector<4x256xf32>
    %c0_16 = arith.constant 0 : index
    %c8 = arith.constant 8 : index
    %c0_17 = arith.constant 0 : index
    %30 = vector.load %arg5[%c0_16, %c8, %c0_17] : memref<2x36x256xf32, #tpu.memory_space<vmem>>, vector<1x4x256xf32>
    %31 = vector.shape_cast %30 : vector<1x4x256xf32> to vector<4x256xf32>
    %32 = vector.shape_cast %29 : vector<4x256xf32> to vector<1x4x256xf32>
    tpu.vector_store %arg5[%c0_16, %c8, %c0_17], %32 {strides = array<i32>} : memref<2x36x256xf32, #tpu.memory_space<vmem>>, vector<1x4x256xf32>,
    %33 = vector.extract_strided_slice %28 {offsets = [4, 0], sizes = [4, 256], strides = [1, 1]} : vector<8x256xf32> to vector<4x256xf32>
    %c1_18 = arith.constant 1 : index
    %c8_19 = arith.constant 8 : index
    %c0_20 = arith.constant 0 : index
    %34 = vector.load %arg5[%c1_18, %c8_19, %c0_20] : memref<2x36x256xf32, #tpu.memory_space<vmem>>, vector<1x4x256xf32>
    %35 = vector.shape_cast %34 : vector<1x4x256xf32> to vector<4x256xf32>
    %36 = vector.shape_cast %33 : vector<4x256xf32> to vector<1x4x256xf32>
    tpu.vector_store %arg5[%c1_18, %c8_19, %c0_20], %36 {strides = array<i32>} : memref<2x36x256xf32, #tpu.memory_space<vmem>>, vector<1x4x256xf32>,
    %c2_i32 = arith.constant 2 : i32
    %37 = tpu.dynamic_rotate %0 by %c2_i32 dim 1 : vector<8x256xf32>, i32 -> vector<8x256xf32>
    %c3 = arith.constant 3 : index
    %c0_21 = arith.constant 0 : index
    %38 = vector.load %arg2[%c3, %c0_21] : memref<9x256xf32, #tpu.memory_space<vmem>>, vector<1x256xf32>
    %39 = vector.broadcast %38 : vector<1x256xf32> to vector<8x256xf32>
    %40 = arith.mulf %37, %39 : vector<8x256xf32>
    %41 = vector.extract_strided_slice %40 {offsets = [0, 0], sizes = [4, 256], strides = [1, 1]} : vector<8x256xf32> to vector<4x256xf32>
    %c0_22 = arith.constant 0 : index
    %c12 = arith.constant 12 : index
    %c0_23 = arith.constant 0 : index
    %42 = vector.load %arg5[%c0_22, %c12, %c0_23] : memref<2x36x256xf32, #tpu.memory_space<vmem>>, vector<1x4x256xf32>
    %43 = vector.shape_cast %42 : vector<1x4x256xf32> to vector<4x256xf32>
    %44 = vector.shape_cast %41 : vector<4x256xf32> to vector<1x4x256xf32>
    tpu.vector_store %arg5[%c0_22, %c12, %c0_23], %44 {strides = array<i32>} : memref<2x36x256xf32, #tpu.memory_space<vmem>>, vector<1x4x256xf32>,
    %45 = vector.extract_strided_slice %40 {offsets = [4, 0], sizes = [4, 256], strides = [1, 1]} : vector<8x256xf32> to vector<4x256xf32>
    %c1_24 = arith.constant 1 : index
    %c12_25 = arith.constant 12 : index
    %c0_26 = arith.constant 0 : index
    %46 = vector.load %arg5[%c1_24, %c12_25, %c0_26] : memref<2x36x256xf32, #tpu.memory_space<vmem>>, vector<1x4x256xf32>
    %47 = vector.shape_cast %46 : vector<1x4x256xf32> to vector<4x256xf32>
    %48 = vector.shape_cast %45 : vector<4x256xf32> to vector<1x4x256xf32>
    tpu.vector_store %arg5[%c1_24, %c12_25, %c0_26], %48 {strides = array<i32>} : memref<2x36x256xf32, #tpu.memory_space<vmem>>, vector<1x4x256xf32>,
    %c4_27 = arith.constant 4 : index
    %c0_28 = arith.constant 0 : index
    %49 = vector.load %arg2[%c4_27, %c0_28] : memref<9x256xf32, #tpu.memory_space<vmem>>, vector<1x256xf32>
    %50 = vector.broadcast %49 : vector<1x256xf32> to vector<8x256xf32>
    %51 = arith.mulf %0, %50 : vector<8x256xf32>
    %52 = vector.extract_strided_slice %51 {offsets = [0, 0], sizes = [4, 256], strides = [1, 1]} : vector<8x256xf32> to vector<4x256xf32>
    %c0_29 = arith.constant 0 : index
    %c16 = arith.constant 16 : index
    %c0_30 = arith.constant 0 : index
    %53 = vector.load %arg5[%c0_29, %c16, %c0_30] : memref<2x36x256xf32, #tpu.memory_space<vmem>>, vector<1x4x256xf32>
    %54 = vector.shape_cast %53 : vector<1x4x256xf32> to vector<4x256xf32>
    %55 = vector.shape_cast %52 : vector<4x256xf32> to vector<1x4x256xf32>
    tpu.vector_store %arg5[%c0_29, %c16, %c0_30], %55 {strides = array<i32>} : memref<2x36x256xf32, #tpu.memory_space<vmem>>, vector<1x4x256xf32>,
    %56 = vector.extract_strided_slice %51 {offsets = [4, 0], sizes = [4, 256], strides = [1, 1]} : vector<8x256xf32> to vector<4x256xf32>
    %c1_31 = arith.constant 1 : index
    %c16_32 = arith.constant 16 : index
    %c0_33 = arith.constant 0 : index
    %57 = vector.load %arg5[%c1_31, %c16_32, %c0_33] : memref<2x36x256xf32, #tpu.memory_space<vmem>>, vector<1x4x256xf32>
    %58 = vector.shape_cast %57 : vector<1x4x256xf32> to vector<4x256xf32>
    %59 = vector.shape_cast %56 : vector<4x256xf32> to vector<1x4x256xf32>
    tpu.vector_store %arg5[%c1_31, %c16_32, %c0_33], %59 {strides = array<i32>} : memref<2x36x256xf32, #tpu.memory_space<vmem>>, vector<1x4x256xf32>,
    %c254_i32 = arith.constant 254 : i32
    %60 = tpu.dynamic_rotate %0 by %c254_i32 dim 1 : vector<8x256xf32>, i32 -> vector<8x256xf32>
    %c5 = arith.constant 5 : index
    %c0_34 = arith.constant 0 : index
    %61 = vector.load %arg2[%c5, %c0_34] : memref<9x256xf32, #tpu.memory_space<vmem>>, vector<1x256xf32>
    %62 = vector.broadcast %61 : vector<1x256xf32> to vector<8x256xf32>
    %63 = arith.mulf %60, %62 : vector<8x256xf32>
    %64 = vector.extract_strided_slice %63 {offsets = [0, 0], sizes = [4, 256], strides = [1, 1]} : vector<8x256xf32> to vector<4x256xf32>
    %c0_35 = arith.constant 0 : index
    %c20 = arith.constant 20 : index
    %c0_36 = arith.constant 0 : index
    %65 = vector.load %arg5[%c0_35, %c20, %c0_36] : memref<2x36x256xf32, #tpu.memory_space<vmem>>, vector<1x4x256xf32>
    %66 = vector.shape_cast %65 : vector<1x4x256xf32> to vector<4x256xf32>
    %67 = vector.shape_cast %64 : vector<4x256xf32> to vector<1x4x256xf32>
    tpu.vector_store %arg5[%c0_35, %c20, %c0_36], %67 {strides = array<i32>} : memref<2x36x256xf32, #tpu.memory_space<vmem>>, vector<1x4x256xf32>,
    %68 = vector.extract_strided_slice %63 {offsets = [4, 0], sizes = [4, 256], strides = [1, 1]} : vector<8x256xf32> to vector<4x256xf32>
    %c1_37 = arith.constant 1 : index
    %c20_38 = arith.constant 20 : index
    %c0_39 = arith.constant 0 : index
    %69 = vector.load %arg5[%c1_37, %c20_38, %c0_39] : memref<2x36x256xf32, #tpu.memory_space<vmem>>, vector<1x4x256xf32>
    %70 = vector.shape_cast %69 : vector<1x4x256xf32> to vector<4x256xf32>
    %71 = vector.shape_cast %68 : vector<4x256xf32> to vector<1x4x256xf32>
    tpu.vector_store %arg5[%c1_37, %c20_38, %c0_39], %71 {strides = array<i32>} : memref<2x36x256xf32, #tpu.memory_space<vmem>>, vector<1x4x256xf32>,
    %c226_i32 = arith.constant 226 : i32
    %72 = tpu.dynamic_rotate %0 by %c226_i32 dim 1 : vector<8x256xf32>, i32 -> vector<8x256xf32>
    %c6 = arith.constant 6 : index
    %c0_40 = arith.constant 0 : index
    %73 = vector.load %arg2[%c6, %c0_40] : memref<9x256xf32, #tpu.memory_space<vmem>>, vector<1x256xf32>
    %74 = vector.broadcast %73 : vector<1x256xf32> to vector<8x256xf32>
    %75 = arith.mulf %72, %74 : vector<8x256xf32>
    %76 = vector.extract_strided_slice %75 {offsets = [0, 0], sizes = [4, 256], strides = [1, 1]} : vector<8x256xf32> to vector<4x256xf32>
    %c0_41 = arith.constant 0 : index
    %c24 = arith.constant 24 : index
    %c0_42 = arith.constant 0 : index
    %77 = vector.load %arg5[%c0_41, %c24, %c0_42] : memref<2x36x256xf32, #tpu.memory_space<vmem>>, vector<1x4x256xf32>
    %78 = vector.shape_cast %77 : vector<1x4x256xf32> to vector<4x256xf32>
    %79 = vector.shape_cast %76 : vector<4x256xf32> to vector<1x4x256xf32>
    tpu.vector_store %arg5[%c0_41, %c24, %c0_42], %79 {strides = array<i32>} : memref<2x36x256xf32, #tpu.memory_space<vmem>>, vector<1x4x256xf32>,
    %80 = vector.extract_strided_slice %75 {offsets = [4, 0], sizes = [4, 256], strides = [1, 1]} : vector<8x256xf32> to vector<4x256xf32>
    %c1_43 = arith.constant 1 : index
    %c24_44 = arith.constant 24 : index
    %c0_45 = arith.constant 0 : index
    %81 = vector.load %arg5[%c1_43, %c24_44, %c0_45] : memref<2x36x256xf32, #tpu.memory_space<vmem>>, vector<1x4x256xf32>
    %82 = vector.shape_cast %81 : vector<1x4x256xf32> to vector<4x256xf32>
    %83 = vector.shape_cast %80 : vector<4x256xf32> to vector<1x4x256xf32>
    tpu.vector_store %arg5[%c1_43, %c24_44, %c0_45], %83 {strides = array<i32>} : memref<2x36x256xf32, #tpu.memory_space<vmem>>, vector<1x4x256xf32>,
    %c224_i32 = arith.constant 224 : i32
    %84 = tpu.dynamic_rotate %0 by %c224_i32 dim 1 : vector<8x256xf32>, i32 -> vector<8x256xf32>
    %c7 = arith.constant 7 : index
    %c0_46 = arith.constant 0 : index
    %85 = vector.load %arg2[%c7, %c0_46] : memref<9x256xf32, #tpu.memory_space<vmem>>, vector<1x256xf32>
    %86 = vector.broadcast %85 : vector<1x256xf32> to vector<8x256xf32>
    %87 = arith.mulf %84, %86 : vector<8x256xf32>
    %88 = vector.extract_strided_slice %87 {offsets = [0, 0], sizes = [4, 256], strides = [1, 1]} : vector<8x256xf32> to vector<4x256xf32>
    %c0_47 = arith.constant 0 : index
    %c28 = arith.constant 28 : index
    %c0_48 = arith.constant 0 : index
    %89 = vector.load %arg5[%c0_47, %c28, %c0_48] : memref<2x36x256xf32, #tpu.memory_space<vmem>>, vector<1x4x256xf32>
    %90 = vector.shape_cast %89 : vector<1x4x256xf32> to vector<4x256xf32>
    %91 = vector.shape_cast %88 : vector<4x256xf32> to vector<1x4x256xf32>
    tpu.vector_store %arg5[%c0_47, %c28, %c0_48], %91 {strides = array<i32>} : memref<2x36x256xf32, #tpu.memory_space<vmem>>, vector<1x4x256xf32>,
    %92 = vector.extract_strided_slice %87 {offsets = [4, 0], sizes = [4, 256], strides = [1, 1]} : vector<8x256xf32> to vector<4x256xf32>
    %c1_49 = arith.constant 1 : index
    %c28_50 = arith.constant 28 : index
    %c0_51 = arith.constant 0 : index
    %93 = vector.load %arg5[%c1_49, %c28_50, %c0_51] : memref<2x36x256xf32, #tpu.memory_space<vmem>>, vector<1x4x256xf32>
    %94 = vector.shape_cast %93 : vector<1x4x256xf32> to vector<4x256xf32>
    %95 = vector.shape_cast %92 : vector<4x256xf32> to vector<1x4x256xf32>
    tpu.vector_store %arg5[%c1_49, %c28_50, %c0_51], %95 {strides = array<i32>} : memref<2x36x256xf32, #tpu.memory_space<vmem>>, vector<1x4x256xf32>,
    %c222_i32 = arith.constant 222 : i32
    %96 = tpu.dynamic_rotate %0 by %c222_i32 dim 1 : vector<8x256xf32>, i32 -> vector<8x256xf32>
    %c8_52 = arith.constant 8 : index
    %c0_53 = arith.constant 0 : index
    %97 = vector.load %arg2[%c8_52, %c0_53] : memref<9x256xf32, #tpu.memory_space<vmem>>, vector<1x256xf32>
    %98 = vector.broadcast %97 : vector<1x256xf32> to vector<8x256xf32>
    %99 = arith.mulf %96, %98 : vector<8x256xf32>
    %100 = vector.extract_strided_slice %99 {offsets = [0, 0], sizes = [4, 256], strides = [1, 1]} : vector<8x256xf32> to vector<4x256xf32>
    %c0_54 = arith.constant 0 : index
    %c32 = arith.constant 32 : index
    %c0_55 = arith.constant 0 : index
    %101 = vector.load %arg5[%c0_54, %c32, %c0_55] : memref<2x36x256xf32, #tpu.memory_space<vmem>>, vector<1x4x256xf32>
    %102 = vector.shape_cast %101 : vector<1x4x256xf32> to vector<4x256xf32>
    %103 = vector.shape_cast %100 : vector<4x256xf32> to vector<1x4x256xf32>
    tpu.vector_store %arg5[%c0_54, %c32, %c0_55], %103 {strides = array<i32>} : memref<2x36x256xf32, #tpu.memory_space<vmem>>, vector<1x4x256xf32>,
    %104 = vector.extract_strided_slice %99 {offsets = [4, 0], sizes = [4, 256], strides = [1, 1]} : vector<8x256xf32> to vector<4x256xf32>
    %c1_56 = arith.constant 1 : index
    %c32_57 = arith.constant 32 : index
    %c0_58 = arith.constant 0 : index
    %105 = vector.load %arg5[%c1_56, %c32_57, %c0_58] : memref<2x36x256xf32, #tpu.memory_space<vmem>>, vector<1x4x256xf32>
    %106 = vector.shape_cast %105 : vector<1x4x256xf32> to vector<4x256xf32>
    %107 = vector.shape_cast %104 : vector<4x256xf32> to vector<1x4x256xf32>
    tpu.vector_store %arg5[%c1_56, %c32_57, %c0_58], %107 {strides = array<i32>} : memref<2x36x256xf32, #tpu.memory_space<vmem>>, vector<1x4x256xf32>,
    %c0_59 = arith.constant 0 : index
    %c0_60 = arith.constant 0 : index
    %108 = vector.load %arg1[%c0_59, %c0_60] : memref<8x36xf32, #tpu.memory_space<vmem>>, vector<8x36xf32>
    %c0_61 = arith.constant 0 : index
    %c0_62 = arith.constant 0 : index
    %c0_63 = arith.constant 0 : index
    %109 = vector.load %arg5[%c0_61, %c0_62, %c0_63] : memref<2x36x256xf32, #tpu.memory_space<vmem>>, vector<1x36x256xf32>
    %110 = vector.shape_cast %109 : vector<1x36x256xf32> to vector<36x256xf32>
    %cst = arith.constant dense<0.000000e+00> : vector<8x256xf32>
    %111 = tpu.matmul %108, %110, %cst {dimension_numbers = #tpu.dot_dimension_numbers<[1], [0], [0], [1], [0, 0, 1, 1], [], []>} : vector<8x36xf32>, vector<36x256xf32>, vector<8x256xf32> -> vector<8x256xf32>
    %c0_64 = arith.constant 0 : index
    %c0_65 = arith.constant 0 : index
    %c0_66 = arith.constant 0 : index
    %112 = vector.load %arg4[%c0_64, %c0_65, %c0_66] : memref<2x8x256xf32, #tpu.memory_space<vmem>>, vector<1x8x256xf32>
    %113 = vector.shape_cast %112 : vector<1x8x256xf32> to vector<8x256xf32>
    %114 = vector.shape_cast %111 : vector<8x256xf32> to vector<1x8x256xf32>
    tpu.vector_store %arg4[%c0_64, %c0_65, %c0_66], %114 {strides = array<i32>} : memref<2x8x256xf32, #tpu.memory_space<vmem>>, vector<1x8x256xf32>,
    %c1_67 = arith.constant 1 : index
    %c0_68 = arith.constant 0 : index
    %c0_69 = arith.constant 0 : index
    %115 = vector.load %arg5[%c1_67, %c0_68, %c0_69] : memref<2x36x256xf32, #tpu.memory_space<vmem>>, vector<1x36x256xf32>
    %116 = vector.shape_cast %115 : vector<1x36x256xf32> to vector<36x256xf32>
    %cst_70 = arith.constant dense<0.000000e+00> : vector<8x256xf32>
    %117 = tpu.matmul %108, %116, %cst_70 {dimension_numbers = #tpu.dot_dimension_numbers<[1], [0], [0], [1], [0, 0, 1, 1], [], []>} : vector<8x36xf32>, vector<36x256xf32>, vector<8x256xf32> -> vector<8x256xf32>
    %c1_71 = arith.constant 1 : index
    %c0_72 = arith.constant 0 : index
    %c0_73 = arith.constant 0 : index
    %118 = vector.load %arg4[%c1_71, %c0_72, %c0_73] : memref<2x8x256xf32, #tpu.memory_space<vmem>>, vector<1x8x256xf32>
    %119 = vector.shape_cast %118 : vector<1x8x256xf32> to vector<8x256xf32>
    %120 = vector.shape_cast %117 : vector<8x256xf32> to vector<1x8x256xf32>
    tpu.vector_store %arg4[%c1_71, %c0_72, %c0_73], %120 {strides = array<i32>} : memref<2x8x256xf32, #tpu.memory_space<vmem>>, vector<1x8x256xf32>,
    %c0_74 = arith.constant 0 : index
    %c0_75 = arith.constant 0 : index
    %c0_76 = arith.constant 0 : index
    %121 = vector.load %arg4[%c0_74, %c0_75, %c0_76] : memref<2x8x256xf32, #tpu.memory_space<vmem>>, vector<2x8x256xf32>
    %cst_77 = arith.constant dense<0.000000e+00> : vector<8xf32>
    %122 = vector.multi_reduction <add>, %121, %cst_77 [0, 2] : vector<2x8x256xf32> to vector<8xf32>
    %123 = vector.shape_cast %122 : vector<8xf32> to vector<1x8x1xf32>
    %cst_78 = arith.constant 5.120000e+02 : f32
    %124 = vector.broadcast %cst_78 : f32 to vector<1x8x1xf32>
    %125 = arith.divf %123, %124 : vector<1x8x1xf32>
    %126 = vector.broadcast %125 : vector<1x8x1xf32> to vector<2x8x256xf32>
    %127 = arith.subf %121, %126 : vector<2x8x256xf32>
    %128 = arith.mulf %127, %127 : vector<2x8x256xf32>
    %cst_79 = arith.constant dense<0.000000e+00> : vector<8xf32>
    %129 = vector.multi_reduction <add>, %128, %cst_79 [0, 2] : vector<2x8x256xf32> to vector<8xf32>
    %130 = vector.shape_cast %129 : vector<8xf32> to vector<1x8x1xf32>
    %cst_80 = arith.constant 5.120000e+02 : f32
    %131 = vector.broadcast %cst_80 : f32 to vector<1x8x1xf32>
    %132 = arith.divf %130, %131 : vector<1x8x1xf32>
    %c0_81 = arith.constant 0 : index
    %c0_82 = arith.constant 0 : index
    %133 = vector.load %arg3[%c0_81, %c0_82] : memref<8x2xf32, #tpu.memory_space<vmem>>, vector<8x1xf32>
    %c0_83 = arith.constant 0 : index
    %c1_84 = arith.constant 1 : index
    %134 = vector.load %arg3[%c0_83, %c1_84] : memref<8x2xf32, #tpu.memory_space<vmem>>, vector<8x1xf32>
    %135 = vector.shape_cast %133 : vector<8x1xf32> to vector<1x8x1xf32>
    %cst_85 = arith.constant 9.99999974E-6 : f32
    %136 = vector.broadcast %cst_85 : f32 to vector<1x8x1xf32>
    %137 = arith.addf %132, %136 : vector<1x8x1xf32>
    %138 = math.rsqrt %137 : vector<1x8x1xf32>
    %139 = arith.mulf %135, %138 : vector<1x8x1xf32>
    %140 = vector.shape_cast %134 : vector<8x1xf32> to vector<1x8x1xf32>
    %141 = arith.mulf %125, %139 : vector<1x8x1xf32>
    %142 = arith.subf %140, %141 : vector<1x8x1xf32>
    %143 = vector.broadcast %139 : vector<1x8x1xf32> to vector<2x8x256xf32>
    %144 = arith.mulf %121, %143 : vector<2x8x256xf32>
    %145 = vector.broadcast %142 : vector<1x8x1xf32> to vector<2x8x256xf32>
    %146 = arith.addf %144, %145 : vector<2x8x256xf32>
    %cst_86 = arith.constant 0.000000e+00 : f32
    %147 = vector.broadcast %cst_86 : f32 to vector<2x8x256xf32>
    %148 = arith.maximumf %146, %147 : vector<2x8x256xf32>
    %c0_87 = arith.constant 0 : index
    %c0_88 = arith.constant 0 : index
    %c0_89 = arith.constant 0 : index
    %149 = vector.load %arg4[%c0_87, %c0_88, %c0_89] : memref<2x8x256xf32, #tpu.memory_space<vmem>>, vector<2x8x256xf32>
    tpu.vector_store %arg4[%c0_87, %c0_88, %c0_89], %148 {strides = array<i32>} : memref<2x8x256xf32, #tpu.memory_space<vmem>>, vector<2x8x256xf32>,
    return
  }
}

</mosaic_0001>

<bundles_post_ra>
// kernel: tpu_custom_call.1
= control target key start
LH: loop header
LB: loop body
LE: loop exit
PB: predicated region body
PF: predicated region fallthrough
CT: control target
= control target key end

     0   :  { %9 = vsyncpa [#allocation4], 0  ;;  %s857_s0 = inlined_call_operand.hbm [shape: f32[8,256], index: 0, kind: input, shape index: {}]   ;;  %s858_s1 = inlined_call_operand.vmem [shape: f32[8,36], index: 1, kind: input, shape index: {}]   ;;  %s859_s2 = inlined_call_operand.hbm [shape: f32[9,256], index: 2, kind: input, shape index: {}]   ;;  %s860_s3 = inlined_call_operand.vmem [shape: f32[8,2], index: 3, kind: input, shape index: {}]   ;;  %s861_s4 = inlined_call_operand.hbm [shape: f32[2,8,256], index: 4, kind: output, shape index: {}]  }
   0x1   :  { %10 = vsyncpa [#allocation7], 0 }
   0x2   :  { %11 = vsyncpa [#allocation5], 0  ;;  %s708_s15 = smov [#allocation3]   ;;  %s709_s17 = smov [#allocation6]  }
   0x3   :  { %s18_s16 = sshll.u32 %s708_s15, 4  ;;  %s29_s18 = sshll.u32 %s709_s17, 4  ;;  %s19_s16 = int_to_ptr.vmem [resolvable:$true] %s18_s16  ;;  %s750_s18 = int_to_ptr.vmem [resolvable:$true] %s29_s18 }
   0x4   :  { %s636_s21 = scalar_lea.hbm %s857_s0, 256 }
   0x5   :  { %p637_p0 = scmp.ne.s32.totalorder %s857_s0, %s636_s21  ;;  %p640_p1 = scmp.lt.u32.totalorder %s636_s21, %s857_s0 }
   0x7   :  { %p642_p2 = pnand %p640_p1, %p637_p0 }
   0x9   :  { %645 = shalt.err (!%p642_p2)
}
   0xa   :  { %s646_s26 = scalar_lea.vmem %s19_s16, 256  ;;  %p651_p4 = scmp.lt.s32.totalorder %s19_s16, %s19_s16 }
   0xb   :  { %p647_p3 = scmp.ne.s32.totalorder %s19_s16, %s646_s26  ;;  %p652_p5 = scmp.lt.s32.totalorder %s646_s26, %s646_s26 }
   0xd   :  { %p653_p6 = por %p652_p5, %p651_p4 }
   0xf   :  { %p654_p7 = pnand %p653_p6, %p647_p3 }
  0x11   :  { %657 = shalt.err (!%p654_p7)
}
  0x12   :  { %21 = dma.hbm_to_vmem [thread:$0]  %s857_s0, 256, %s19_s16, [#allocation4]  }
  0x13   :  { %s658_s5 = scalar_lea.hbm %s859_s2, 512 }
  0x14   :  { %p659_p8 = scmp.ne.s32.totalorder %s859_s2, %s658_s5  ;;  %p662_p9 = scmp.lt.u32.totalorder %s658_s5, %s859_s2 }
  0x16   :  { %p664_p10 = pnand %p662_p9, %p659_p8 }
  0x18   :  { %667 = shalt.err (!%p664_p10)
}
  0x19   :  { %s668_s10 = scalar_lea.vmem %s750_s18, 512  ;;  %p673_p12 = scmp.lt.s32.totalorder %s750_s18, %s750_s18 }
  0x1a   :  { %p669_p11 = scmp.ne.s32.totalorder %s750_s18, %s668_s10  ;;  %p674_p13 = scmp.lt.s32.totalorder %s668_s10, %s668_s10 }
  0x1c   :  { %p675_p0 = por %p674_p13, %p673_p12 }
  0x1e   :  { %p676_p1 = pnand %p675_p0, %p669_p11 }
  0x20   :  { %679 = shalt.err (!%p676_p1)
}
  0x21   :  { %s710_s0 = smov 256   ;;  %s711_s11 = smov 16  }
  0x22   :  { %35 = dma.hbm_to_vmem [thread:$0]  %s859_s2, 512, %s750_s18, [#allocation7], %s710_s0, %s710_s0, %s711_s11  }
  0x23   :  { %702 = dma.done.wait [#allocation4], 256  }
  0x24   :  { %703 = vsyncadd [#allocation4], 4294967040 }
  0x25   :  { %704 = dma.done.wait [#allocation7], 512  }
  0x26   :  { %705 = vsyncadd [#allocation7], 4294966784  ;;  %v50_v0 = vlaneseq  ;;  %v44_v2 = vld [vmem:[#allocation3] sm:$0xff]  ;;  %s712_s14 = smov 2   ;;  %s713_s15 = smov 32   ;;  %v45_v3 = vld [vmem:[#allocation3 + $0x8] sm:$0xff] }
  0x27   :  { %144 = vrot.lane.b32.xlu1 %v44_v2, %s712_s14  ;;  %80 = vrot.lane.b32.xlu0 %v44_v2, %s713_s15  ;;  %v177_v6 = vld [vmem:[#allocation6 + $0x4] ss:$8 sm:$0x3]  ;;  %s714_s2 = smov 34   ;;  %s715_s16 = smov 30   ;;  %v720_v13 = vmov 0.0  }
  0x28   :  { %v58_v1 = vshrl.u32 %v50_v0, 7  ;;  %s716_s17 = smov 126   ;;  %s717_s18 = smov 96   ;;  %415 = vmatprep.mubr.f32.mxu0 %v720_v13  ;;  %504 = vmatprep.mubr.f32.mxu1 %v720_v13  ;;  %v790_v14 = vand.u32 127, %v50_v0  ;;  %vm344_vm8 = vcmask 1043456   ;;  %vm340_vm9 = vcmask 293888  }
  0x29   :  { %s718_s19 = smov 98   ;;  %s719_s20 = smov 94   ;;  %v152_v15 = vld [vmem:[#allocation6 + $0x3] ss:$8 sm:$0x3] }
  0x2a   :  { %v784_v4 = vsub.s32 0, %v58_v1  ;;  %v786_v5 = vsub.s32 1, %v58_v1  ;;  %v88_v16 = vld [vmem:[#allocation6 + $0x1] ss:$8 sm:$0x3]  ;;  %vm148_vm0 = vcmp.lt.s32.totalorder %v790_v14, 2 }
  0x2b   :  { %146 = vrot.lane.b32.xlu1 %v45_v3, %s712_s14  ;;  %82 = vrot.lane.b32.xlu0 %v45_v3, %s713_s15  ;;  %vm84_vm1 = vcmp.lt.s32.totalorder %v790_v14, 32  ;;  %v55_v19 = vld [vmem:[#allocation6] ss:$8 sm:$0x3]  ;;  %vm52_vm2 = vcmp.lt.s32.totalorder %v790_v14, 34  ;;  %vm116_vm3 = vcmp.lt.s32.totalorder %v790_v14, 30 }
  0x2c   :  { %v186_v7 = vrot.slane %v177_v6, %v786_v5  ;;  %v182_v8 = vrot.slane %v177_v6, %v784_v4  ;;  %v157_v20 = vrot.slane %v152_v15, %v784_v4  ;;  %v161_v21 = vrot.slane %v152_v15, %v786_v5  ;;  %v120_v36 = vld [vmem:[#allocation6 + $0x2] ss:$8 sm:$0x3]  ;;  %v209_v49 = vld [vmem:[#allocation6 + $0x5] ss:$8 sm:$0x3] }
  0x2d   :  { %v93_v22 = vrot.slane %v88_v16, %v784_v4  ;;  %v97_v23 = vrot.slane %v88_v16, %v786_v5  ;;  %v60_v26 = vrot.slane %v55_v19, %v784_v4  ;;  %v64_v27 = vrot.slane %v55_v19, %v786_v5  ;;  %v273_v60 = vld [vmem:[#allocation6 + $0x7] ss:$8 sm:$0x3]  ;;  %s723_s24 = smov 1   ;;  %s724_s25 = smov [#allocation8]  }
  0x2e   :  { %v190_v9 = vmul.f32 %v186_v7, %v45_v3  ;;  %v189_v10 = vmul.f32 %v182_v8, %v44_v2  ;;  %v125_v47 = vrot.slane %v120_v36, %v784_v4  ;;  %v129_v48 = vrot.slane %v120_v36, %v786_v5  ;;  %s580_s26 = sshll.u32 %s724_s25, 4  ;;  %s581_s26 = int_to_ptr.vmem [resolvable:$true] %s580_s26 }
  0x2f   :  { %48 = vrot.lane.b32.xlu1 %v45_v3, %s714_s2  ;;  %46 = vrot.lane.b32.xlu0 %v44_v2, %s714_s2  ;;  %vm205_vm4 = vcmp.lt.s32.totalorder %v790_v14, 126  ;;  %v214_v58 = vrot.slane %v209_v49, %v784_v4  ;;  %v218_v59 = vrot.slane %v209_v49, %v786_v5  ;;  %vm269_vm5 = vcmp.lt.s32.totalorder %v790_v14, 96  ;;  %p685_p3 = scmp.lt.s32.totalorder %s581_s26, %s581_s26 }
  0x30   :  { %192 = vst [vmem:[#allocation2 + $0x28] sm:$0xf] %v190_v9  ;;  %191 = vst [vmem:[#allocation2 + $0x20] sm:$0xf] %v189_v10  ;;  %v196_v11 = vrot.slane %v190_v9, 4  ;;  %v195_v12 = vrot.slane %v189_v10, 4  ;;  %v278_v7 = vrot.slane %v273_v60, %v784_v4  ;;  %v282_v8 = vrot.slane %v273_v60, %v786_v5 }
  0x31   :  { %v241_v9 = vld [vmem:[#allocation6 + $0x6] ss:$8 sm:$0x3]  ;;  %vm237_vm6 = vcmp.lt.s32.totalorder %v790_v14, 98  ;;  %vm301_vm7 = vcmp.lt.s32.totalorder %v790_v14, 94 }
  0x32   :  { %200 = vst [vmem:[#allocation2 + $0x78] sm:$0xf] %v196_v11  ;;  %199 = vst [vmem:[#allocation2 + $0x70] sm:$0xf] %v195_v12  ;;  %v246_v19 = vrot.slane %v241_v9, %v784_v4 }
  0x33   :  { %114 = vrot.lane.b32.xlu1 %v45_v3, %s715_s16  ;;  %112 = vrot.lane.b32.xlu0 %v44_v2, %s715_s16 }
  0x37   :  { %203 = vrot.lane.b32.xlu1 %v45_v3, %s716_s17  ;;  %201 = vrot.lane.b32.xlu0 %v44_v2, %s716_s17 }
  0x3b   :  { %267 = vrot.lane.b32.xlu1 %v45_v3, %s717_s18  ;;  %265 = vrot.lane.b32.xlu0 %v44_v2, %s717_s18 }
  0x3f   :  { %235 = vrot.lane.b32.xlu1 %v45_v3, %s718_s19  ;;  %233 = vrot.lane.b32.xlu0 %v44_v2, %s718_s19 }
  0x43   :  { %299 = vrot.lane.b32.xlu1 %v45_v3, %s719_s20  ;;  %297 = vrot.lane.b32.xlu0 %v44_v2, %s719_s20 }
  0x99   :  { %v145_v17 = vpop.permute.xlu1 %144  ;;  %v81_v18 = vpop.permute.xlu0 %80 }
  0x9d   :  { %v147_v24 = vpop.permute.xlu1 %146  ;;  %v83_v25 = vpop.permute.xlu0 %82 }
  0x9e   :  { %v149_v28 = vsel %vm148_vm0, %v145_v17, %v147_v24  ;;  %v150_v29 = vsel %vm148_vm0, %v147_v24, %v145_v17  ;;  %v85_v30 = vsel %vm84_vm1, %v81_v18, %v83_v25  ;;  %v86_v31 = vsel %vm84_vm1, %v83_v25, %v81_v18 }
  0x9f   :  { %v164_v32 = vmul.f32 %v157_v20, %v150_v29  ;;  %v165_v33 = vmul.f32 %v161_v21, %v149_v28  ;;  %v100_v34 = vmul.f32 %v93_v22, %v86_v31  ;;  %v101_v35 = vmul.f32 %v97_v23, %v85_v30  ;;  %v305_v22 = vld [vmem:[#allocation6 + $0x10] ss:$8 sm:$0x3] }
  0xa0   :  { %v250_v20 = vrot.slane %v241_v9, %v786_v5 }
  0xa1   :  { %v168_v37 = vrot.slane %v164_v32, 4  ;;  %v169_v38 = vrot.slane %v165_v33, 4  ;;  %174 = vst [vmem:[#allocation2 + $0x60] sm:$0xf0] %v164_v32  ;;  %175 = vst [vmem:[#allocation2 + $0x68] sm:$0xf0] %v165_v33  ;;  %v49_v41 = vpop.permute.xlu1 %48  ;;  %v47_v42 = vpop.permute.xlu0 %46 }
  0xa2   :  { %v104_v39 = vrot.slane %v100_v34, 4  ;;  %v105_v40 = vrot.slane %v101_v35, 4  ;;  %110 = vst [vmem:[#allocation2 + $0x50] sm:$0xf0] %v100_v34  ;;  %111 = vst [vmem:[#allocation2 + $0x58] sm:$0xf0] %v101_v35  ;;  %v53_v43 = vsel %vm52_vm2, %v47_v42, %v49_v41  ;;  %v54_v44 = vsel %vm52_vm2, %v49_v41, %v47_v42 }
  0xa3   :  { %172 = vst [vmem:[#allocation2 + $0x10] sm:$0xf0] %v168_v37  ;;  %173 = vst [vmem:[#allocation2 + $0x18] sm:$0xf0] %v169_v38  ;;  %v67_v45 = vmul.f32 %v60_v26, %v54_v44  ;;  %v68_v46 = vmul.f32 %v64_v27, %v53_v43  ;;  %v310_v38 = vrot.slane %v305_v22, %v784_v4 }
  0xa4   :  { %108 = vst [vmem:[#allocation2] sm:$0xf0] %v104_v39  ;;  %109 = vst [vmem:[#allocation2 + $0x8] sm:$0xf0] %v105_v40  ;;  %v314_v39 = vrot.slane %v305_v22, %v786_v5 }
  0xa5   :  { %69 = vst [vmem:[#allocation2] sm:$0xf] %v67_v45  ;;  %70 = vst [vmem:[#allocation2 + $0x8] sm:$0xf] %v68_v46  ;;  %v73_v50 = vrot.slane %v67_v45, 4  ;;  %v74_v51 = vrot.slane %v68_v46, 4  ;;  %v115_v52 = vpop.permute.xlu1 %114  ;;  %v113_v53 = vpop.permute.xlu0 %112 }
  0xa6   :  { %v117_v54 = vsel %vm116_vm3, %v113_v53, %v115_v52  ;;  %v118_v55 = vsel %vm116_vm3, %v115_v52, %v113_v53 }
  0xa7   :  { %78 = vst [vmem:[#allocation2 + $0x50] sm:$0xf] %v73_v50  ;;  %79 = vst [vmem:[#allocation2 + $0x58] sm:$0xf] %v74_v51  ;;  %v132_v56 = vmul.f32 %v125_v47, %v118_v55  ;;  %v133_v57 = vmul.f32 %v129_v48, %v117_v54 }
  0xa9   :  { %134 = vst [vmem:[#allocation2 + $0x10] sm:$0xf] %v132_v56  ;;  %135 = vst [vmem:[#allocation2 + $0x18] sm:$0xf] %v133_v57  ;;  %v138_v61 = vrot.slane %v132_v56, 4  ;;  %v139_v62 = vrot.slane %v133_v57, 4  ;;  %v204_v63 = vpop.permute.xlu1 %203  ;;  %v202_v0 = vpop.permute.xlu0 %201 }
  0xaa   :  { %v206_v1 = vsel %vm205_vm4, %v202_v0, %v204_v63  ;;  %v207_v2 = vsel %vm205_vm4, %v204_v63, %v202_v0 }
  0xab   :  { %142 = vst [vmem:[#allocation2 + $0x60] sm:$0xf] %v138_v61  ;;  %143 = vst [vmem:[#allocation2 + $0x68] sm:$0xf] %v139_v62  ;;  %v221_v3 = vmul.f32 %v214_v58, %v206_v1  ;;  %v222_v6 = vmul.f32 %v218_v59, %v207_v2  ;;  %v329_v1 = vld [vmem:[%s858_s1] sm:$0xff] }
  0xac   :  { %v331_v21 = vld [vmem:[#allocation2 + $0x8] sm:$0xff]  ;;  %v330_v24 = vld [vmem:[#allocation2] sm:$0xff] }
  0xad   :  { %v225_v10 = vrot.slane %v221_v3, 4  ;;  %v226_v11 = vrot.slane %v222_v6, 4  ;;  %231 = vst [vmem:[#allocation2 + $0x70] sm:$0xf0] %v221_v3  ;;  %232 = vst [vmem:[#allocation2 + $0x78] sm:$0xf0] %v222_v6  ;;  %v268_v12 = vpop.permute.xlu1 %267  ;;  %v266_v13 = vpop.permute.xlu0 %265 }
  0xae   :  { %v270_v15 = vsel %vm269_vm5, %v266_v13, %v268_v12  ;;  %v271_v16 = vsel %vm269_vm5, %v268_v12, %v266_v13  ;;  %v425_v32 = vld [vmem:[#allocation2 + $0x58] sm:$0xff]  ;;  %v424_v36 = vld [vmem:[#allocation2 + $0x50] sm:$0xff] }
  0xaf   :  { %229 = vst [vmem:[#allocation2 + $0x20] sm:$0xf0] %v225_v10  ;;  %230 = vst [vmem:[#allocation2 + $0x28] sm:$0xf0] %v226_v11  ;;  %v285_v17 = vmul.f32 %v278_v7, %v270_v15  ;;  %v286_v18 = vmul.f32 %v282_v8, %v271_v16 }
  0xb0   :  { %v333_v23 = vld [vmem:[#allocation2 + $0x18] sm:$0xff]  ;;  %v332_v25 = vld [vmem:[#allocation2 + $0x10] sm:$0xff] }
  0xb1   :  { %v289_v26 = vrot.slane %v285_v17, 4  ;;  %v290_v27 = vrot.slane %v286_v18, 4  ;;  %295 = vst [vmem:[#allocation2 + $0x80] sm:$0xf0] %v285_v17  ;;  %296 = vst [vmem:[#allocation2 + $0x88] sm:$0xf0] %v286_v18  ;;  %v236_v28 = vpop.permute.xlu1 %235  ;;  %v234_v29 = vpop.permute.xlu0 %233  ;;  %v599_v30 = vpack.c.bf16 %v333_v23, %v331_v21  ;;  %v601_v31 = vpack.c.bf16 %v332_v25, %v330_v24 }
  0xb2   :  { %v238_v33 = vsel %vm237_vm6, %v234_v29, %v236_v28  ;;  %v239_v34 = vsel %vm237_vm6, %v236_v28, %v234_v29  ;;  %v427_v35 = vld [vmem:[#allocation2 + $0x68] sm:$0xff]  ;;  %v426_v37 = vld [vmem:[#allocation2 + $0x60] sm:$0xff] }
  0xb3   :  { %293 = vst [vmem:[#allocation2 + $0x30] sm:$0xf0] %v289_v26  ;;  %294 = vst [vmem:[#allocation2 + $0x38] sm:$0xf0] %v290_v27  ;;  %v253_v40 = vmul.f32 %v246_v19, %v238_v33  ;;  %v254_v41 = vmul.f32 %v250_v20, %v239_v34  ;;  %600 = vmatprep.subr.bf16.mxu0 %v599_v30  ;;  %v607_v42 = vpack.c.bf16 %v427_v35, %v425_v32  ;;  %v721_v27 = vmov 0   ;;  %v539_v32 = vld [vmem:[%s860_s3] sm:$0xff] }
  0xb4   :  { %v609_v43 = vpack.c.bf16 %v426_v37, %v424_v36  ;;  %602 = vmatpush1.bf16.msra.mxu0 %v601_v31  ;;  %v429_v58 = vld [vmem:[#allocation2 + $0x78] sm:$0xff]  ;;  %v428_v14 = vld [vmem:[#allocation2 + $0x70] sm:$0xff]  ;;  %632 = vset.pattern.permute.xlu1 %v721_v27  ;;  %v722_v31 = vmov 1   ;;  %s680_s3 = scalar_lea.vmem %s581_s26, 512 }
  0xb5   :  { %255 = vst [vmem:[#allocation2 + $0x30] sm:$0xf] %v253_v40  ;;  %256 = vst [vmem:[#allocation2 + $0x38] sm:$0xf] %v254_v41  ;;  %v259_v44 = vrot.slane %v253_v40, 4  ;;  %v260_v45 = vrot.slane %v254_v41, 4  ;;  %608 = vmatprep.subr.bf16.mxu1 %v607_v42  ;;  %v300_v46 = vpop.permute.xlu1 %299  ;;  %v298_v47 = vpop.permute.xlu0 %297  ;;  %633 = vset.pattern.permute.xlu0 %v722_v31  ;;  %p681_p2 = scmp.ne.s32.totalorder %s581_s26, %s680_s3  ;;  %p686_p4 = scmp.lt.s32.totalorder %s680_s3, %s680_s3 }
  0xb6   :  { %610 = vmatpush1.bf16.msra.mxu1 %v609_v43  ;;  %v302_v4 = vsel %vm301_vm7, %v298_v47, %v300_v46  ;;  %v303_v5 = vsel %vm301_vm7, %v300_v46, %v298_v47  ;;  %v335_v52 = vld [vmem:[#allocation2 + $0x28] sm:$0xff]  ;;  %v334_v54 = vld [vmem:[#allocation2 + $0x20] sm:$0xff] }
  0xb7   :  { %263 = vst [vmem:[#allocation2 + $0x80] sm:$0xf] %v259_v44  ;;  %264 = vst [vmem:[#allocation2 + $0x88] sm:$0xf] %v260_v45  ;;  %v317_v48 = vmul.f32 %v310_v38, %v302_v4  ;;  %v318_v49 = vmul.f32 %v314_v39, %v303_v5  ;;  %p687_p5 = por %p686_p4, %p685_p3 }
  0xb9   :  { %319 = vst [vmem:[#allocation2 + $0x40] sm:$0xf] %v317_v48  ;;  %320 = vst [vmem:[#allocation2 + $0x48] sm:$0xf] %v318_v49  ;;  %v323_v50 = vrot.slane %v317_v48, 4  ;;  %v324_v51 = vrot.slane %v318_v49, 4  ;;  %p688_p6 = pnand %p687_p5, %p681_p2 }
  0xbb   :  { %327 = vst [vmem:[#allocation2 + $0x90] sm:$0xf] %v323_v50  ;;  %328 = vst [vmem:[#allocation2 + $0x98] sm:$0xf] %v324_v51 }
  0xbc   :  { %v337_v53 = vld [vmem:[#allocation2 + $0x38] sm:$0xff]  ;;  %v336_v55 = vld [vmem:[#allocation2 + $0x30] sm:$0xff] }
  0xbd   :  { %v603_v56 = vpack.c.bf16 %v337_v53, %v335_v52  ;;  %v605_v57 = vpack.c.bf16 %v336_v55, %v334_v54 }
  0xbe   :  { %v431_v59 = vld [vmem:[#allocation2 + $0x88] sm:$0xff]  ;;  %v430_v60 = vld [vmem:[#allocation2 + $0x80] sm:$0xff] }
  0xbf   :  { %604 = vmatprep.subr.bf16.mxu0 %v603_v56  ;;  %v611_v61 = vpack.c.bf16 %v431_v59, %v429_v58  ;;  %v613_v62 = vpack.c.bf16 %v430_v60, %v428_v14 }
  0xc0   :  { %606 = vmatpush1.bf16.msra.mxu0 %v605_v57  ;;  %v339_v63 = vld [vmem:[#allocation2 + $0x48] sm:$0xf]  ;;  %v338_v0 = vld [vmem:[#allocation2 + $0x40] sm:$0xf] }
  0xc1   :  { %612 = vmatprep.subr.bf16.mxu1 %v611_v61  ;;  %593 = vmatprep.subr.msk.mxu0 %vm344_vm8, %v339_v63 }
  0xc2   :  { %614 = vmatpush1.bf16.msra.mxu1 %v613_v62  ;;  %v433_v2 = vld [vmem:[#allocation2 + $0x98] sm:$0xf]  ;;  %v432_v3 = vld [vmem:[#allocation2 + $0x90] sm:$0xf] }
  0xc3   :  { %596 = vmatprep.subr.msk.mxu1 %vm344_vm8, %v433_v2 }
  0xc4   :  { %594 = vmatpush1.msk.msra.mxu0 %vm344_vm8, %v338_v0 }
  0xc5   :  { %595 = vmatmul.mubr.msk.f32.vlgmr.msra.gmra.mrb[0].mxu0 %vm340_vm9, %v329_v1 }
  0xc6   :  { %597 = vmatpush1.msk.msra.mxu1 %vm344_vm8, %v432_v3 }
  0xc7   :  { %598 = vmatmul.mubr.msk.f32.vlgmr.msra.gmra.mrb[0].mxu1 %vm340_vm9, %v329_v1 }
 0x198   :  { %v417_v6 = vpop.f32.mrb[0].mxu0 }
 0x199   :  { %v419_v7 = vpop.f32.mrb[1].mxu0 }
 0x19a   :  { %v506_v8 = vpop.f32.mrb[0].mxu1  ;;  %v518_v9 = vadd.f32 %v419_v7, %v417_v6 }
 0x19b   :  { %v508_v10 = vpop.f32.mrb[1].mxu1 }
 0x19c   :  { %v519_v11 = vadd.f32 %v518_v9, %v506_v8 }
 0x19e   :  { %v520_v12 = vadd.f32 %v519_v11, %v508_v10 }
 0x1a0   :  { %521 = vadd.xlane.f32.xlu0 %v520_v12 }
 0x22d   :  { %v522_v13 = vpop.xlane.xlu0 %521 }
 0x22e   :  { %v524_v15 = vmul.f32 0.001953125, %v522_v13 }
 0x230   :  { %v525_v16 = vsub.f32 %v417_v6, %v524_v15  ;;  %v526_v17 = vsub.f32 %v419_v7, %v524_v15  ;;  %v527_v18 = vsub.f32 %v506_v8, %v524_v15  ;;  %v528_v19 = vsub.f32 %v508_v10, %v524_v15 }
 0x232   :  { %v529_v20 = vmul.f32 %v525_v16, %v525_v16  ;;  %v530_v21 = vmul.f32 %v526_v17, %v526_v17  ;;  %v531_v22 = vmul.f32 %v527_v18, %v527_v18  ;;  %v532_v24 = vmul.f32 %v528_v19, %v528_v19 }
 0x234   :  { %v533_v23 = vadd.f32 %v530_v21, %v529_v20 }
 0x236   :  { %v534_v25 = vadd.f32 %v533_v23, %v531_v22 }
 0x238   :  { %v535_v26 = vadd.f32 %v534_v25, %v532_v24 }
 0x23a   :  { %536 = vadd.xlane.f32.xlu1 %v535_v26 }
 0x2c7   :  { %v537_v28 = vpop.xlane.xlu1 %536 }
 0x2c8   :  { %v538_v29 = vmul.f32 0.001953125, %v537_v28 }
 0x2ca   :  { %v540_v30 = vadd.f32 1e-05, %v538_v29 }
 0x2cc   :  { %634 = vrsqrt.f32 %v540_v30 }
 0x2d6   :  { %v635_v33 = vpop.eup %634 }
 0x2d7   :  { %v542_v34 = vmul.f32 %v635_v33, %v539_v32 }
 0x2d9   :  { %551 = vperm.xlu1 %632, %v542_v34   ;;  %v543_v35 = vmul.f32 %v542_v34, %v524_v15 }
 0x2db   :  { %545 = vrot.lane.b32.xlu0 %v543_v35, %s723_s24 }
 0x34d   :  { %v546_v36 = vpop.permute.xlu0 %545 }
 0x34e   :  { %v548_v37 = vsub.f32 %v539_v32, %v546_v36 }
 0x350   :  { %560 = vperm.xlu0 %633, %v548_v37  }
 0x358   :  { %v552_v38 = vpop.permute.xlu1 %551 }
 0x359   :  { %v554_v39 = vmul.f32 %v552_v38, %v417_v6  ;;  %v555_v40 = vmul.f32 %v552_v38, %v419_v7  ;;  %v556_v41 = vmul.f32 %v552_v38, %v506_v8  ;;  %v557_v42 = vmul.f32 %v552_v38, %v508_v10 }
 0x3cf   :  { %v561_v43 = vpop.permute.xlu0 %560 }
 0x3d0   :  { %v563_v44 = vadd.f32 %v561_v43, %v554_v39  ;;  %v564_v45 = vadd.f32 %v561_v43, %v555_v40  ;;  %v565_v46 = vadd.f32 %v561_v43, %v556_v41  ;;  %v566_v47 = vadd.f32 %v561_v43, %v557_v42 }
 0x3d2   :  { %v567_v4 = vmax.f32 %v563_v44, 0.0  ;;  %v568_v5 = vmax.f32 %v564_v45, 0.0  ;;  %v569_v48 = vmax.f32 %v565_v46, 0.0  ;;  %v570_v49 = vmax.f32 %v566_v47, 0.0 }
 0x3d4   :  { %571 = vst [vmem:[#allocation8] sm:$0xff] %v567_v4  ;;  %572 = vst [vmem:[#allocation8 + $0x8] sm:$0xff] %v568_v5 }
 0x3d5   :  { %573 = vst [vmem:[#allocation8 + $0x10] sm:$0xff] %v569_v48  ;;  %574 = vst [vmem:[#allocation8 + $0x18] sm:$0xff] %v570_v49 }
 0x3d6   :  { %691 = shalt.err (!%p688_p6)
}
 0x3d7   :  { %s692_s29 = scalar_lea.hbm %s861_s4, 512 }
 0x3d8   :  { %p693_p7 = scmp.ne.s32.totalorder %s861_s4, %s692_s29  ;;  %p696_p8 = scmp.lt.u32.totalorder %s692_s29, %s861_s4 }
 0x3da   :  { %p698_p9 = pnand %p696_p8, %p693_p7 }
 0x3dc   :  { %701 = shalt.err (!%p698_p9)
}
 0x3dd   :  { %586 = dma.vmem_to_hbm [thread:$0]  %s581_s26, 512, %s861_s4, [#allocation5], %s710_s0, %s710_s0, %s711_s11  }
 0x3de   :  { %706 = dma.done.wait [#allocation5], 512  }
 0x3df   :  { %707 = vsyncadd [#allocation5], 4294966784 }
 0x3e0   :  { %590 = vsyncpa [#allocation4], 1 }
 0x3e1   :  { %591 = vsyncpa [#allocation7], 1 }
 0x3e2   :  { %592 = vsyncpa [#allocation5], 1 }

</bundles_post_ra>
